<compile_context>
chip_gen: v5e
topology: v5e:2x2
jax: 0.10.0
libtpu: 0.0.40
codegen_flags: <defaults>
</compile_context>

<pallas_src>
import math

import jax
import jax.numpy as jnp
from jax.experimental import pallas as pl
from jax.experimental.pallas import tpu as pltpu


# ------------------------------ helpers -------------------------------------

def _round_up(x, m):
    return ((x + m - 1) // m) * m


def _pick_tile(dim, prefs):
    """Largest preferred tile dividing `dim`, else the full dim (legal block)."""
    for t in prefs:
        if dim >= t and dim % t == 0:
            return t
    # TODO(synk): masked-tail handling for huge dims with no aligned divisor.
    return dim


def _plan_rows(m):
    """Row tile + padded row count for the linear kernel (sublane aligned)."""
    if m <= 512:
        mp = _round_up(m, 8)
        return mp, mp
    for t in (512, 256, 128):
        if m % t == 0:
            return t, m
    return 256, _round_up(m, 256)


# ------------------------- tiled linear (no bias) ---------------------------

def _linear_kernel(x_ref, w_ref, o_ref, acc_ref):
    # Blocks: x [tm, tk], w [tk, tn], o [tm, tn]; accumulate over the k axis.
    @pl.when(pl.program_id(2) == 0)
    def _():
        acc_ref[...] = jnp.zeros_like(acc_ref)

    acc_ref[...] += jnp.dot(
        x_ref[...], w_ref[...], preferred_element_type=jnp.float32
    )

    @pl.when(pl.program_id(2) == pl.num_programs(2) - 1)
    def _():
        o_ref[...] = acc_ref[...].astype(o_ref.dtype)


def pallas_linear(x2d, w_t):
    """x2d: [M, Cin], w_t: [Cin, Cout] (pre-transposed) -> [M, Cout]."""
    M, Kc = x2d.shape
    N = w_t.shape[1]
    tm, Mp = _plan_rows(M)
    if Mp != M:
        x2d = jnp.pad(x2d, ((0, Mp - M), (0, 0)))
    # Lane-dense (>=128) output tiles whenever Cout allows; full-dim otherwise.
    tn = _pick_tile(N, (512, 256, 128))
    tk = _pick_tile(Kc, (1024, 512, 256, 128))
    grid = (Mp // tm, N // tn, Kc // tk)
    out = pl.pallas_call(
        _linear_kernel,
        out_shape=jax.ShapeDtypeStruct((Mp, N), x2d.dtype),
        grid=grid,
        in_specs=[
            pl.BlockSpec((tm, tk), lambda i, j, k: (i, k)),
            pl.BlockSpec((tk, tn), lambda i, j, k: (k, j)),
        ],
        out_specs=pl.BlockSpec((tm, tn), lambda i, j, k: (i, j)),
        scratch_shapes=[pltpu.VMEM((tm, tn), jnp.float32)],
        compiler_params=pltpu.CompilerParams(
            dimension_semantics=("parallel", "parallel", "arbitrary")
        ),
    )(x2d, w_t)
    return out[:M] if Mp != M else out


# -------------------- flash-style multi-head attention ----------------------

def _make_bias_index_map(per_batch, per_q, per_k):
    def idx(b, qi, ki):
        return (b if per_batch else 0, 0,
                qi if per_q else 0, ki if per_k else 0)
    return idx


def _make_flash_kernel(H, D, n_bias, has_gate):
    HD = H * D
    NEG_INF = -1e30  # large finite init: avoids NaN from (-inf)-(-inf)

    def kernel(*refs):
        qg_ref, kv_ref = refs[0], refs[1]
        bias_refs = refs[2:2 + n_bias]
        o_ref = refs[2 + n_bias]
        m_ref, l_ref, acc_ref = refs[3 + n_bias:6 + n_bias]

        ki = pl.program_id(2)

        @pl.when(ki == 0)
        def _():
            m_ref[...] = jnp.full_like(m_ref, NEG_INF)
            l_ref[...] = jnp.zeros_like(l_ref)
            acc_ref[...] = jnp.zeros_like(acc_ref)

        # Head-broadcast biases are small ([tq|1, tk]); load once per step.
        shared_biases = []
        head_biases = []
        for b_ref in bias_refs:
            if b_ref.shape[1] == 1:
                shared_biases.append(b_ref[0, 0].astype(jnp.float32))
            else:
                head_biases.append(b_ref)

        for h in range(H):
            q_h = qg_ref[0, :, h * D:(h + 1) * D]             # [tq, D]
            k_h = kv_ref[0, :, h * D:(h + 1) * D]             # [tk, D]
            v_h = kv_ref[0, :, HD + h * D:HD + (h + 1) * D]   # [tk, D]

            # Transposed-contraction matmul (no k relayout); f32 accumulation.
            s = jnp.einsum("qd,kd->qk", q_h, k_h,
                           preferred_element_type=jnp.float32)  # [tq, tk]
            for sb in shared_biases:
                s = s + sb
            for b_ref in head_biases:
                s = s + b_ref[0, h].astype(jnp.float32)

            # Online softmax update (flash-style), normalization deferred.
            m_prev = m_ref[h]                                   # [tq, 1]
            m_new = jnp.maximum(m_prev, jnp.max(s, axis=-1, keepdims=True))
            alpha = jnp.exp(m_prev - m_new)
            # TODO(synk): evaluate exp in bf16 on v6e/v7x (bf16 EUP, ~2x exp
            # throughput); kept f32 so one kernel stays accurate on v5e.
            p = jnp.exp(s - m_new)
            l_ref[h] = alpha * l_ref[h] + jnp.sum(p, axis=-1, keepdims=True)
            acc_ref[h] = alpha * acc_ref[h] + jnp.dot(
                p.astype(kv_ref.dtype), v_h,
                preferred_element_type=jnp.float32)
            m_ref[h] = m_new

        @pl.when(ki == pl.num_programs(2) - 1)
        def _():
            # Deferred normalization on [tq, D] outputs (approx EUP reciprocal,
            # not a [tq, tk] divide), sigmoid gate on the whole slab, then ONE
            # dense lane-major [tq, H*D] store.
            inv_l = pl.reciprocal(l_ref[...], approx=True)      # [H, tq, 1]
            parts = [acc_ref[h] * inv_l[h] for h in range(H)]
            o_slab = jnp.concatenate(parts, axis=-1)            # [tq, H*D]
            if has_gate:
                gate = jax.nn.sigmoid(qg_ref[0, :, HD:].astype(jnp.float32))
                o_slab = o_slab * gate
            o_ref[0] = o_slab.astype(o_ref.dtype)

    return kernel


def _attn_vmem_limit(tq, tk, H, D, g_cols, biases, itemsize):
    """Scoped-VMEM request sized from the chosen tiles (with headroom)."""
    HD = H * D
    blocks = tq * g_cols + tk * 2 * HD + tq * HD          # qg + kv + out
    for bias in biases:
        _, hb, qb, kb = bias.shape
        blocks += hb * (tq if qb != 1 else 1) * (tk if kb != 1 else 1)
    est = 2 * blocks * itemsize                            # double-buffered
    est += 3 * H * tq * 128 * 4                            # m/l/acc (lane pad)
    est += 4 * tq * max(tk, 128) * 4                       # live f32 scores
    est += 4 << 20                                         # headroom
    return int(min(max(est, 32 << 20), 64 << 20))


def pallas_flash_attention(qg, kv, biases, H, D):
    """qg: [B, Q, (1|2)*H*D] (q columns first, gate second if present),
    kv: [B, K, 2*H*D] (k columns first, v second), biases: list of
    [1|B, H|1, Q|1, K|1]. Returns [B, Q, H*D], heads flattened lane-dense."""
    Bf, Q, g_cols = qg.shape
    K = kv.shape[1]
    HD = H * D
    has_gate = g_cols == 2 * HD

    tq = _pick_tile(Q, (256, 128, 64, 32, 16, 8))
    tk = _pick_tile(K, (512, 256, 128))  # mult of 128 keeps bias blocks legal
    grid = (Bf, Q // tq, K // tk)

    in_specs = [
        pl.BlockSpec((1, tq, g_cols), lambda b, qi, ki: (b, qi, 0)),
        pl.BlockSpec((1, tk, 2 * HD), lambda b, qi, ki: (b, ki, 0)),
    ]
    inputs = [qg, kv]
    for bias in biases:
        Bb, Hb, Qb, Kb = bias.shape
        assert Bb in (1, Bf) and Hb in (1, H) and Qb in (1, Q) and Kb in (1, K)
        blk = (1, Hb, tq if Qb == Q else 1, tk if Kb == K else 1)
        in_specs.append(
            pl.BlockSpec(blk, _make_bias_index_map(Bb != 1, Qb != 1, Kb != 1)))
        inputs.append(bias)

    itemsize = jnp.dtype(qg.dtype).itemsize
    cost = pl.CostEstimate(
        flops=4 * Bf * H * Q * K * D,            # QK^T + PV
        transcendentals=Bf * H * Q * K,          # exp
        bytes_accessed=int(
            (int(qg.size) + int(kv.size) + Bf * Q * HD) * itemsize
            + sum(int(b.size) * jnp.dtype(b.dtype).itemsize for b in biases)),
    )

    kernel = _make_flash_kernel(H, D, len(biases), has_gate)
    return pl.pallas_call(
        kernel,
        out_shape=jax.ShapeDtypeStruct((Bf, Q, HD), qg.dtype),
        grid=grid,
        in_specs=in_specs,
        out_specs=pl.BlockSpec((1, tq, HD), lambda b, qi, ki: (b, qi, 0)),
        scratch_shapes=[
            pltpu.VMEM((H, tq, 1), jnp.float32),   # running max   m
            pltpu.VMEM((H, tq, 1), jnp.float32),   # running denom l
            pltpu.VMEM((H, tq, D), jnp.float32),   # unnormalized output acc
        ],
        compiler_params=pltpu.CompilerParams(
            dimension_semantics=("parallel", "parallel", "arbitrary"),
            vmem_limit_bytes=_attn_vmem_limit(tq, tk, H, D, g_cols, biases,
                                              itemsize),
        ),
        cost_estimate=cost,
    )(*inputs)


# ------------------------------ forward glue --------------------------------

def _prepare_params(params, c_hidden, compute_dtype):
    """One-time weight prep: fold 1/sqrt(D) into w_q, fuse q|g and k|v into a
    single matmul each, pre-transpose to [in, out] (no per-call w.T pass)."""
    scale = 1.0 / math.sqrt(c_hidden)
    w_q = jnp.asarray(params["w_q"], jnp.float32) * scale     # [H*D, C_q]
    if params.get("w_g") is not None:
        w_qg = jnp.concatenate(
            [w_q, jnp.asarray(params["w_g"], jnp.float32)], axis=0)
    else:
        w_qg = w_q
    w_kv = jnp.concatenate(
        [jnp.asarray(params["w_k"], jnp.float32),
         jnp.asarray(params["w_v"], jnp.float32)], axis=0)
    return {
        "w_qg_t": w_qg.T.astype(compute_dtype),    # [C_q, (1|2)*H*D]
        "w_kv_t": w_kv.T.astype(compute_dtype),    # [C_k, 2*H*D]
        "w_o_t": jnp.asarray(params["w_o"], jnp.float32).T.astype(compute_dtype),
    }


def attention_forward(params, q_x, kv_x, biases, no_heads, c_hidden,
                      compute_dtype=jnp.bfloat16):
    """Mirrors Attention.forward (stock path).  Activations are cast to
    `compute_dtype` (bf16 recommended); all accumulation stays f32."""
    if biases is None:
        biases = []
    batch = q_x.shape[:-2]
    Q = q_x.shape[-2]
    K = kv_x.shape[-2]
    H, D = no_heads, c_hidden
    HD = H * D
    Cq = q_x.shape[-1]
    Ck = kv_x.shape[-1]
    out_dtype = q_x.dtype
    has_gate = params.get("w_g") is not None

    prep = _prepare_params(params, D, compute_dtype)

    Bf = 1
    for d in batch:
        Bf *= int(d)

    # _prep_qkv (fused): q|g in one matmul, k|v in one matmul.
    qg = pallas_linear(q_x.astype(compute_dtype).reshape(Bf * Q, Cq),
                       prep["w_qg_t"])
    kv = pallas_linear(kv_x.astype(compute_dtype).reshape(Bf * K, Ck),
                       prep["w_kv_t"])

    # Metadata-only reshapes (no HBM slicing / head transposes): the attention
    # kernel consumes the fused [*, S, (1|2)*H*D] layouts directly.
    qg = qg.reshape(Bf, Q, (2 if has_gate else 1) * HD)
    kv = kv.reshape(Bf, K, 2 * HD)

    # Normalize each bias to [1|Bf, H|1, Q|1, K|1] and stream it in compute
    # dtype; the broadcast [B,H,Q,K] bias sum is never materialized in HBM.
    norm_biases = []
    for b in biases:
        b4 = b.reshape((-1,) + b.shape[-3:]).astype(compute_dtype)
        assert b4.shape[0] in (1, Bf), b4.shape
        norm_biases.append(b4)

    # Fused flash attention core: softmax(QK^T + biases)V with gating epilogue,
    # lane-dense [Q, H*D] output (no post-hoc [*,H,Q,D] transpose needed).
    o = pallas_flash_attention(qg, kv, norm_biases, H, D)   # [Bf, Q, H*D]

    # _wrap_up: final projection (gate already applied in the kernel epilogue).
    out = pallas_linear(o.reshape(Bf * Q, HD), prep["w_o_t"])
    return out.reshape(*batch, Q, prep["w_o_t"].shape[1]).astype(out_dtype)


def reference_forward(params, q_x, kv_x, biases, no_heads, c_hidden):
    """Pure-JAX reference (mirrors the PyTorch stock path)."""
    batch = q_x.shape[:-2]
    Q = q_x.shape[-2]
    K = kv_x.shape[-2]
    H, D = no_heads, c_hidden

    def lin(x, w):
        return jnp.einsum("...i,oi->...o", x, w)

    q = lin(q_x, params["w_q"]).reshape(*batch, Q, H, D).swapaxes(-2, -3)
    k = lin(kv_x, params["w_k"]).reshape(*batch, K, H, D).swapaxes(-2, -3)
    v = lin(kv_x, params["w_v"]).reshape(*batch, K, H, D).swapaxes(-2, -3)
    q = q / math.sqrt(D)
    a = jnp.einsum("...qd,...kd->...qk", q, k)
    for b in biases:
        a = a + b
    a = jax.nn.softmax(a, axis=-1)
    o = jnp.einsum("...qk,...kd->...qd", a, v).swapaxes(-2, -3)
    if params.get("w_g") is not None:
        g = jax.nn.sigmoid(lin(q_x, params["w_g"])).reshape(*batch, Q, H, D)
        o = o * g
    o = o.reshape(*batch, Q, H * D)
    return lin(o, params["w_o"])


# ---------------------------------- main -------------------------------------

if __name__ == "__main__":
    # Small shapes, but chosen so the kernel exercises multiple batch steps,
    # multiple Q tiles and multiple K tiles (online-softmax accumulation path).
    B, Q, K = 2, 24, 384
    C_q = C_k = C_v = 16
    H, D = 4, 8  # no_heads, c_hidden

    key = jax.random.PRNGKey(0)
    ks = jax.random.split(key, 9)

    q_x = jax.random.normal(ks[0], (B, Q, C_q), jnp.float32)
    kv_x = jax.random.normal(ks[1], (B, K, C_k), jnp.float32)

    # Biases that broadcast to [B, H, Q, K]: a key-mask bias (large negative,
    # finite -- -inf would NaN fully-masked rows in both kernel and reference)
    # and a pair-style bias.
    keep = jax.random.bernoulli(ks[2], 0.85, (B, 1, 1, K))
    mask_bias = (1.0 - keep.astype(jnp.float32)) * -1e9
    pair_bias = jax.random.normal(ks[3], (1, H, Q, K), jnp.float32)
    biases = [mask_bias, pair_bias]

    # Deterministic synthetic weights, PyTorch-style [out, in], bias=False.
    # NOTE: the real module inits w_o ('final') and w_g ('gating') to zeros;
    # small random weights keep the numerical check nontrivial.
    def init_w(k_, out_dim, in_dim):
        return jax.random.normal(k_, (out_dim, in_dim), jnp.float32) / math.sqrt(in_dim)

    params = {
        "w_q": init_w(ks[4], H * D, C_q),
        "w_k": init_w(ks[5], H * D, C_k),
        "w_v": init_w(ks[6], H * D, C_v),
        "w_g": init_w(ks[7], H * D, C_q),
        "w_o": init_w(ks[8], C_q, H * D),
    }

    ref = reference_forward(params, q_x, kv_x, biases, H, D)

    # f32 path: checks the flash/online-softmax logic (tolerance covers the
    # approx EUP reciprocal and XLA's default matmul precision in the ref).
    out_f32 = attention_forward(params, q_x, kv_x, biases, H, D,
                                compute_dtype=jnp.float32)
    out_f32 = jax.block_until_ready(out_f32)
    assert out_f32.shape == (B, Q, C_q), out_f32.shape
    err32 = float(jnp.max(jnp.abs(out_f32 - ref)))
    assert jnp.allclose(out_f32, ref, atol=3e-2, rtol=3e-2), err32

    # bf16 production path (f32 accumulation): looser sanity check.
    out_bf16 = attention_forward(params, q_x, kv_x, biases, H, D,
                                 compute_dtype=jnp.bfloat16)
    out_bf16 = jax.block_until_ready(out_bf16)
    assert out_bf16.shape == (B, Q, C_q), out_bf16.shape
    err16 = float(jnp.max(jnp.abs(out_bf16.astype(jnp.float32) - ref)))
    assert jnp.allclose(out_bf16.astype(jnp.float32), ref,
                        atol=2e-1, rtol=2e-1), err16

    print("KERNEL_OK")
</pallas_src>

<mosaic_0001>
module attributes {stable_mosaic.version = 11 : i64} {
  func.func @_linear_kernel(%arg0: i32, %arg1: i32, %arg2: i32, %arg3: memref<48x16xf32, #tpu.memory_space<vmem>>, %arg4: memref<16x64xf32, #tpu.memory_space<vmem>>, %arg5: memref<48x64xf32, #tpu.memory_space<vmem>>, %arg6: memref<48x64xf32, #tpu.memory_space<vmem>>) attributes {dimension_semantics = [#tpu.dimension_semantics<parallel>, #tpu.dimension_semantics<parallel>, #tpu.dimension_semantics<arbitrary>], iteration_bounds = array<i64: 1, 1, 1>, scalar_prefetch = 0 : i64, scratch_operands = 1 : i64, tpu.core_type = #tpu.core_type<tc>, window_params = [{transform_indices = @transform_0, window_bounds = array<i64: 48, 16>}, {transform_indices = @transform_1, window_bounds = array<i64: 16, 64>}, {transform_indices = @transform_2, window_bounds = array<i64: 48, 64>}]} {
    %c0_i32 = arith.constant 0 : i32
    %0 = arith.cmpi eq, %arg2, %c0_i32 : i32
    %1 = arith.extui %0 : i1 to i32
    %c0_i32_0 = arith.constant 0 : i32
    %2 = arith.cmpi ne, %1, %c0_i32_0 : i32
    scf.if %2 {
      %cst_10 = arith.constant 0.000000e+00 : f32
      %12 = vector.broadcast %cst_10 : f32 to vector<48x64xf32>
      %c0_11 = arith.constant 0 : index
      %c0_12 = arith.constant 0 : index
      %13 = vector.load %arg6[%c0_11, %c0_12] : memref<48x64xf32, #tpu.memory_space<vmem>>, vector<48x64xf32>
      tpu.vector_store %arg6[%c0_11, %c0_12], %12 {strides = array<i32>} : memref<48x64xf32, #tpu.memory_space<vmem>>, vector<48x64xf32>,
    } else {
    }
    %c0 = arith.constant 0 : index
    %c0_1 = arith.constant 0 : index
    %3 = vector.load %arg6[%c0, %c0_1] : memref<48x64xf32, #tpu.memory_space<vmem>>, vector<48x64xf32>
    %c0_2 = arith.constant 0 : index
    %c0_3 = arith.constant 0 : index
    %4 = vector.load %arg3[%c0_2, %c0_3] : memref<48x16xf32, #tpu.memory_space<vmem>>, vector<48x16xf32>
    %c0_4 = arith.constant 0 : index
    %c0_5 = arith.constant 0 : index
    %5 = vector.load %arg4[%c0_4, %c0_5] : memref<16x64xf32, #tpu.memory_space<vmem>>, vector<16x64xf32>
    %cst = arith.constant dense<0.000000e+00> : vector<48x64xf32>
    %6 = tpu.matmul %4, %5, %cst {dimension_numbers = #tpu.dot_dimension_numbers<[1], [0], [0], [1], [0, 0, 1, 1], [], []>} : vector<48x16xf32>, vector<16x64xf32>, vector<48x64xf32> -> vector<48x64xf32>
    %7 = arith.addf %3, %6 : vector<48x64xf32>
    %c0_6 = arith.constant 0 : index
    %c0_7 = arith.constant 0 : index
    %8 = vector.load %arg6[%c0_6, %c0_7] : memref<48x64xf32, #tpu.memory_space<vmem>>, vector<48x64xf32>
    tpu.vector_store %arg6[%c0_6, %c0_7], %7 {strides = array<i32>} : memref<48x64xf32, #tpu.memory_space<vmem>>, vector<48x64xf32>,
    %c0_i32_8 = arith.constant 0 : i32
    %9 = arith.cmpi eq, %arg2, %c0_i32_8 : i32
    %10 = arith.extui %9 : i1 to i32
    %c0_i32_9 = arith.constant 0 : i32
    %11 = arith.cmpi ne, %10, %c0_i32_9 : i32
    scf.if %11 {
      %c0_10 = arith.constant 0 : index
      %c0_11 = arith.constant 0 : index
      %12 = vector.load %arg6[%c0_10, %c0_11] : memref<48x64xf32, #tpu.memory_space<vmem>>, vector<48x64xf32>
      %c0_12 = arith.constant 0 : index
      %c0_13 = arith.constant 0 : index
      %13 = vector.load %arg5[%c0_12, %c0_13] : memref<48x64xf32, #tpu.memory_space<vmem>>, vector<48x64xf32>
      tpu.vector_store %arg5[%c0_12, %c0_13], %12 {strides = array<i32>} : memref<48x64xf32, #tpu.memory_space<vmem>>, vector<48x64xf32>,
    } else {
    }
    return
  }
  func.func @transform_0(%arg0: i32, %arg1: i32, %arg2: i32) -> (i32, i32) {
    %c0_i32 = arith.constant 0 : i32
    return %arg0, %arg2 : i32, i32
  }
  func.func @transform_1(%arg0: i32, %arg1: i32, %arg2: i32) -> (i32, i32) {
    %c0_i32 = arith.constant 0 : i32
    return %arg2, %arg1 : i32, i32
  }
  func.func @transform_2(%arg0: i32, %arg1: i32, %arg2: i32) -> (i32, i32) {
    %c0_i32 = arith.constant 0 : i32
    return %arg0, %arg1 : i32, i32
  }
}

</mosaic_0001>

<bundles_post_ra>
// kernel: tpu_custom_call.1
= control target key start
LH: loop header
LB: loop body
LE: loop exit
PB: predicated region body
PF: predicated region fallthrough
CT: control target
= control target key end

     0   :  { %vm16_vm0 = vcmask 523264   ;;  %vm37_vm1 = vcmask 130048   ;;  %v179_v4 = vmov 0.0   ;;  %s249_s0 = inlined_call_operand.vmem [shape: f32[48,16], index: 0, kind: input, shape index: {}]   ;;  %s250_s1 = inlined_call_operand.vmem [shape: f32[16,64], index: 1, kind: input, shape index: {}]   ;;  %s251_s2 = inlined_call_operand.hbm [shape: f32[48,64], index: 2, kind: output, shape index: {}]  }
   0x1   :  { %v36_v0 = vld [vmem:[%s250_s1 + $0x8] sm:$0xff]  ;;  %v35_v1 = vld [vmem:[%s250_s1] sm:$0xff]  ;;  %v32_v2 = vld [vmem:[%s249_s0 + $0x18] sm:$0xff]  ;;  %18 = vst.msk [vmem:[#allocation2 + $0x8] sm:$0xff] %vm16_vm0, %v179_v4 }
   0x2   :  { %144 = vmatpush.msra.mxu2 %v36_v0  ;;  %143 = vmatpush.msra.mxu1 %v36_v0  ;;  %v30_v3 = vld [vmem:[%s249_s0 + $0x8] sm:$0xff]  ;;  %17 = vst.msk [vmem:[#allocation2] sm:$0xff] %vm16_vm0, %v179_v4 }
   0x3   :  { %145 = vmatpush.msra.mxu3 %v36_v0  ;;  %70 = vmatpush.msra.mxu0 %v36_v0 }
   0x4   :  { %7 = vsyncpa [#allocation4], 0  ;;  %147 = vmatpush.msra.mxu2 %v35_v1  ;;  %146 = vmatpush.msra.mxu1 %v35_v1  ;;  %v34_v5 = vld [vmem:[%s249_s0 + $0x28] sm:$0xff]  ;;  %v29_v6 = vld [vmem:[%s249_s0] sm:$0xff]  ;;  %19 = vst.msk [vmem:[#allocation2 + $0x10] sm:$0xff] %vm16_vm0, %v179_v4  ;;  %s125_s27 = sshll.u32 %s251_s2, 4  ;;  %s126_s27 = int_to_ptr.hbm [resolvable:$true] %s125_s27 }
   0x5   :  { %140 = vmatmul.msk.f32.vlgmr.msra.gmra.mxu2 %vm37_vm1, %v32_v2  ;;  %138 = vmatmul.msk.f32.vlgmr.msra.gmra.mxu1 %vm37_vm1, %v30_v3  ;;  %20 = vst.msk [vmem:[#allocation2 + $0x18] sm:$0xff] %vm16_vm0, %v179_v4  ;;  %v33_v7 = vld [vmem:[%s249_s0 + $0x20] sm:$0xff]  ;;  %v31_v8 = vld [vmem:[%s249_s0 + $0x10] sm:$0xff]  ;;  %s180_s0 = smov [#allocation3]   ;;  %s181_s28 = smov 128  }
   0x6   :  { %148 = vmatpush.msra.mxu3 %v35_v1  ;;  %71 = vmatpush.msra.mxu0 %v35_v1  ;;  %21 = vst.msk [vmem:[#allocation2 + $0x20] sm:$0xff] %vm16_vm0, %v179_v4  ;;  %s123_s24 = sshll.u32 %s180_s0, 4  ;;  %s182_s29 = smov 8   ;;  %s124_s24 = int_to_ptr.vmem [resolvable:$true] %s123_s24 }
   0x7   :  { %142 = vmatmul.msk.f32.vlgmr.msra.gmra.mxu3 %vm37_vm1, %v34_v5  ;;  %137 = vmatmul.msk.f32.vlgmr.msra.gmra.mxu0 %vm37_vm1, %v29_v6  ;;  %22 = vst.msk [vmem:[#allocation2 + $0x28] sm:$0xff] %vm16_vm0, %v179_v4 }
   0x8   :  { %v24_v9 = vld [vmem:[#allocation2 + $0x8] sm:$0xff] }
   0x9   :  { %v23_v11 = vld [vmem:[#allocation2] sm:$0xff] }
   0xb   :  { %v25_v17 = vld [vmem:[#allocation2 + $0x10] sm:$0xff] }
   0xc   :  { %v26_v15 = vld [vmem:[#allocation2 + $0x18] sm:$0xff] }
   0xd   :  { %141 = vmatmul.msk.f32.gmra.mxu2 %vm37_vm1, %v33_v7  ;;  %139 = vmatmul.msk.f32.gmra.mxu1 %vm37_vm1, %v31_v8  ;;  %v27_v25 = vld [vmem:[#allocation2 + $0x20] sm:$0xff] }
   0xe   :  { %v28_v18 = vld [vmem:[#allocation2 + $0x28] sm:$0xff] }
  0x82   :  { %v76_v10 = vpop.f32.mrf.mxu1 }
  0x83   :  { %v92_v12 = vadd.f32 %v76_v10, %v24_v9 }
  0x84   :  { %v73_v13 = vpop.f32.mrf.mxu0 }
  0x85   :  { %99 = vst.msk [vmem:[#allocation2 + $0x8] sm:$0xff] %vm16_vm0, %v92_v12  ;;  %v91_v14 = vadd.f32 %v73_v13, %v23_v11 }
  0x87   :  { %98 = vst.msk [vmem:[#allocation2] sm:$0xff] %vm16_vm0, %v91_v14 }
  0x88   :  { %v82_v16 = vpop.f32.mrf.mxu2 }
  0x89   :  { %v94_v19 = vadd.f32 %v82_v16, %v26_v15 }
  0x8a   :  { %v79_v20 = vpop.f32.mrf.mxu1  ;;  %v88_v21 = vpop.f32.mrf.mxu3 }
  0x8b   :  { %101 = vst.msk [vmem:[#allocation2 + $0x18] sm:$0xff] %vm16_vm0, %v94_v19  ;;  %v93_v22 = vadd.f32 %v79_v20, %v25_v17  ;;  %v96_v23 = vadd.f32 %v88_v21, %v28_v18 }
  0x8c   :  { %v108_v24 = vld [vmem:[#allocation2 + $0x8] sm:$0xff] }
  0x8d   :  { %100 = vst.msk [vmem:[#allocation2 + $0x10] sm:$0xff] %vm16_vm0, %v93_v22 }
  0x8e   :  { %103 = vst.msk [vmem:[#allocation2 + $0x28] sm:$0xff] %vm16_vm0, %v96_v23  ;;  %v107_v26 = vld [vmem:[#allocation2] sm:$0xff] }
  0x8f   :  { %113 = vst.msk [vmem:[#allocation3] sm:$0xff] %vm16_vm0, %v107_v26 }
  0x90   :  { %v85_v27 = vpop.f32.mrf.mxu2  ;;  %114 = vst.msk [vmem:[#allocation3 + $0x8] sm:$0xff] %vm16_vm0, %v108_v24 }
  0x91   :  { %v95_v28 = vadd.f32 %v85_v27, %v27_v25 }
  0x92   :  { %v110_v29 = vld [vmem:[#allocation2 + $0x18] sm:$0xff] }
  0x93   :  { %102 = vst.msk [vmem:[#allocation2 + $0x20] sm:$0xff] %vm16_vm0, %v95_v28 }
  0x94   :  { %v109_v30 = vld [vmem:[#allocation2 + $0x10] sm:$0xff]  ;;  %116 = vst.msk [vmem:[#allocation3 + $0x18] sm:$0xff] %vm16_vm0, %v110_v29 }
  0x95   :  { %v112_v31 = vld [vmem:[#allocation2 + $0x28] sm:$0xff]  ;;  %115 = vst.msk [vmem:[#allocation3 + $0x10] sm:$0xff] %vm16_vm0, %v109_v30 }
  0x96   :  { %118 = vst.msk [vmem:[#allocation3 + $0x28] sm:$0xff] %vm16_vm0, %v112_v31 }
  0x9a   :  { %v111_v32 = vld [vmem:[#allocation2 + $0x20] sm:$0xff] }
  0x9b   :  { %117 = vst.msk [vmem:[#allocation3 + $0x20] sm:$0xff] %vm16_vm0, %v111_v32 }
  0x9c   :  { %131 = dma.vmem_to_hbm [thread:$0]  %s124_s24, 768, %s126_s27, [#allocation4], %s181_s28, %s181_s28, %s182_s29  }
  0x9d   :  { %177 = dma.done.wait [#allocation4], 768  }
  0x9e   :  { %178 = vsyncadd [#allocation4], 4294966528 }
  0x9f   :  { %136 = vsyncpa [#allocation4], 1 }

</bundles_post_ra>
